<compile_context>
chip_gen: v7x
topology: tpu7x:2x2x1
jax: 0.10.0
libtpu: 0.0.40
codegen_flags: <defaults>
</compile_context>

<pallas_src>
import jax
import jax.numpy as jnp
from jax import lax
from jax.experimental import pallas as pl
from jax.experimental.pallas import tpu as pltpu

EPS = 1e-5                       # nn.InstanceNorm1d default eps
_INV_SQRT2 = 0.7071067811865476  # 1/sqrt(2), for exact (erf-based) GELU


def linear_block_kernel(x_ref, w_ref, b_ref, o_ref):
    """One grid step processes a (TM, L) tile of the flattened (N*C, L) input.

    x_ref: (TM, L)        input dtype  -- TM independent InstanceNorm rows
    w_ref: (L, OUT_COLS)  bf16         -- Linear weight, pre-transposed (maybe padded)
    b_ref: (1, OUT_COLS)  f32          -- Linear bias (maybe padded)
    o_ref: (TM, OUT_COLS) f32
    """
    x = x_ref[...].astype(jnp.float32)   # norm math stays f32 in vregs

    # InstanceNorm1d (affine=False): per-row mean / biased variance over L.
    mean = jnp.mean(x, axis=-1, keepdims=True)
    centered = x - mean
    var = jnp.mean(centered * centered, axis=-1, keepdims=True)
    xn = centered * lax.rsqrt(var + EPS)

    # Exact (erf-based) GELU, matching F.gelu(approximate='none').
    g = 0.5 * xn * (1.0 + lax.erf(xn * _INV_SQRT2))

    # Linear on the MXU: bf16 inputs, f32 accumulation.
    y = jnp.dot(g.astype(jnp.bfloat16), w_ref[...],
                preferred_element_type=jnp.float32)

    # F.dropout with p=0 is the identity.
    # TODO(synk): nonzero dropout would need pltpu.prng_seed/prng_random_bits masking.
    o_ref[...] = (y + b_ref[...]).astype(o_ref.dtype)


def _round_up(v, m):
    return (v + m - 1) // m * m


def _phys_bytes(rows, cols, itemsize, sublanes=8):
    """Physical VMEM footprint of a (rows, cols) tile under (sublanes,128) tiling."""
    return _round_up(max(rows, 1), sublanes) * _round_up(max(cols, 1), 128) * itemsize


def _vmem_bytes(tm, l, out_cols, x_itemsize):
    x_tile = _phys_bytes(tm, l, x_itemsize, sublanes=(16 if x_itemsize == 2 else 8))
    o_tile = _phys_bytes(tm, out_cols, 4)
    w_res = _phys_bytes(l, out_cols, 2, sublanes=16)   # bf16 packs 16 sublanes
    b_res = _phys_bytes(1, out_cols, 4)
    # x/out tiles are double-buffered by the pipeline; weight/bias are
    # single-buffered (pipeline_mode=pl.Buffered(1), constant index_map).
    return 2 * (x_tile + o_tile) + (w_res + b_res)


def _vmem_budget_bytes():
    """Chip-dependent tiling budget with headroom for Mosaic internal scratch."""
    try:
        phys = int(pltpu.get_tpu_info().vmem_capacity_bytes)
    except Exception:
        phys = 64 * 1024 * 1024        # conservative: v7x per-TensorCore VMEM
    # v7x (64 MiB)  -> ~48 MiB;  v5e/v6e (128 MiB) -> ~96 MiB.
    return max(16 * 1024 * 1024, min(phys - 16 * 1024 * 1024, int(phys * 0.75)))


def _choose_row_tile(rows, l, out_cols, x_itemsize, budget):
    rows8 = _round_up(rows, 8)
    # Pipelining: aim for >= 4 grid steps (>= 2 for small problems) so input
    # DMA, compute and output writeback overlap; never collapse to grid=(1,)
    # unless the whole problem is a single 8-row tile.
    if rows8 >= 64:
        target_steps = 4
    elif rows8 >= 16:
        target_steps = 2
    else:
        target_steps = 1
    tm = min(1024, _round_up(pl.cdiv(rows8, target_steps), 8))
    # Enforce the VMEM budget against the physical tiled footprint.
    while tm > 8 and _vmem_bytes(tm, l, out_cols, x_itemsize) > budget:
        tm = max(8, _round_up(tm // 2, 8))
    # Best-effort even step count so v7x's two TensorCores split the
    # "parallel" grid axis evenly (free on v5e/v6e).
    steps = pl.cdiv(rows8, tm)
    if steps >= 2 and steps % 2 == 1:
        tm_even = max(8, _round_up(pl.cdiv(rows8, steps + 1), 8))
        if pl.cdiv(rows8, tm_even) % 2 == 0:
            tm = tm_even
    return tm


def linear_block_forward(x, weight, bias):
    """x: (N, C, L) with C == L == in_features; weight: (out, L); bias: (out,).

    Returns (N, C, out) f32.
    """
    N, C, L = x.shape
    out_features = weight.shape[0]

    rows = N * C
    out_p = _round_up(out_features, 128)
    # Lane-dense (128-multiple) output stores are preferred, but when padding
    # would >= 2x the output HBM bytes (tiny out_features) write the unpadded
    # column count instead: masked vst but far less writeback traffic, and no
    # post-call column slice.
    out_cols = out_features if out_p >= 2 * out_features else out_p

    x_itemsize = jnp.dtype(x.dtype).itemsize
    budget = _vmem_budget_bytes()
    tm = _choose_row_tile(rows, L, out_cols, x_itemsize, budget)
    rows_p = _round_up(rows, tm)

    x2d = x.reshape(rows, L)               # keep caller dtype; kernel upcasts
    if rows_p != rows:
        # Zero rows are harmless (var + eps > 0) and are sliced away below.
        x2d = jnp.pad(x2d, ((0, rows_p - rows), (0, 0)))

    # One-time tiny weight prep (reused across calls): pad columns (if any),
    # pre-transpose to (L, out_cols), cast to bf16 for the MXU.
    w_t = jnp.pad(weight, ((0, out_cols - out_features), (0, 0))).T.astype(jnp.bfloat16)
    b2d = jnp.pad(bias, (0, out_cols - out_features)).reshape(1, out_cols).astype(jnp.float32)

    grid = (rows_p // tm,)
    cost = pl.CostEstimate(
        flops=2 * rows_p * L * out_cols,
        transcendentals=rows_p * L,  # erf
        bytes_accessed=(rows_p * L * x_itemsize) + (L * out_cols * 2) + (out_cols * 4)
                       + (rows_p * out_cols * 4),
    )
    need = _vmem_bytes(tm, L, out_cols, x_itemsize)
    vmem_limit = int(min(budget, max(32 * 1024 * 1024, 2 * need)))

    out2d = pl.pallas_call(
        linear_block_kernel,
        out_shape=jax.ShapeDtypeStruct((rows_p, out_cols), jnp.float32),
        grid_spec=pltpu.PrefetchScalarGridSpec(
            num_scalar_prefetch=0,
            grid=grid,
            in_specs=[
                pl.BlockSpec((tm, L), lambda i: (i, 0)),            # row tile (double-buffered)
                pl.BlockSpec((L, out_cols), lambda i: (0, 0),       # resident weight
                             pipeline_mode=pl.Buffered(1)),
                pl.BlockSpec((1, out_cols), lambda i: (0, 0),       # resident bias
                             pipeline_mode=pl.Buffered(1)),
            ],
            out_specs=pl.BlockSpec((tm, out_cols), lambda i: (i, 0)),
        ),
        compiler_params=pltpu.CompilerParams(
            dimension_semantics=("parallel",),
            vmem_limit_bytes=vmem_limit,
        ),
        cost_estimate=cost,
    )(x2d, w_t, b2d)

    if rows_p != rows or out_cols != out_features:
        out2d = out2d[:rows, :out_features]
    return out2d.reshape(N, C, out_features)


def reference_forward(x, weight, bias):
    """Pure-JAX f32 reference of the PyTorch forward (dropout p=0)."""
    x = x.astype(jnp.float32)
    mean = jnp.mean(x, axis=-1, keepdims=True)
    var = jnp.mean((x - mean) ** 2, axis=-1, keepdims=True)
    xn = (x - mean) / jnp.sqrt(var + EPS)
    g = jax.nn.gelu(xn, approximate=False)
    return jnp.einsum("ncl,ol->nco", g, weight) + bias


def reference_forward_bf16(x, weight, bias):
    """Reference matching the kernel's quantization (bf16 MXU inputs, f32 acc)."""
    x = x.astype(jnp.float32)
    mean = jnp.mean(x, axis=-1, keepdims=True)
    c = x - mean
    var = jnp.mean(c * c, axis=-1, keepdims=True)
    xn = c * lax.rsqrt(var + EPS)
    g = (0.5 * xn * (1.0 + lax.erf(xn * _INV_SQRT2))).astype(jnp.bfloat16)
    y = jnp.einsum("ncl,ol->nco", g, weight.astype(jnp.bfloat16),
                   preferred_element_type=jnp.float32)
    return y + bias


if __name__ == "__main__":
    in_features = 16
    out_features = 32
    N, C, L = 2, in_features, in_features   # (batch, channels, length), C == L == in_features

    key = jax.random.PRNGKey(0)
    kx, kw, kb = jax.random.split(key, 3)

    x = jax.random.normal(kx, (N, C, L), dtype=jnp.float32)
    # Deterministic PyTorch-like Linear init: U(-1/sqrt(in), 1/sqrt(in)).
    bound = 1.0 / (in_features ** 0.5)
    weight = jax.random.uniform(kw, (out_features, in_features), jnp.float32,
                                minval=-bound, maxval=bound)
    bias = jax.random.uniform(kb, (out_features,), jnp.float32,
                              minval=-bound, maxval=bound)

    out = jax.block_until_ready(linear_block_forward(x, weight, bias))
    assert out.shape == (N, C, out_features)

    # Tight check vs. a reference with the same bf16 MXU quantization.
    ref16 = reference_forward_bf16(x, weight, bias)
    assert jnp.allclose(out, ref16, atol=2e-3, rtol=2e-3), "mismatch vs bf16-matched reference"

    # Looser check vs. the full-f32 PyTorch-equivalent reference (bf16 MXU path).
    ref32 = reference_forward(x, weight, bias)
    assert jnp.allclose(out, ref32, atol=5e-2, rtol=5e-2), "mismatch vs f32 reference"

    print("KERNEL_OK")
</pallas_src>

<mosaic_0001>
module attributes {stable_mosaic.version = 11 : i64} {
  func.func @linear_block_kernel(%arg0: i32, %arg1: memref<16x16xf32, #tpu.memory_space<vmem>>, %arg2: memref<16x32xbf16, #tpu.memory_space<vmem>>, %arg3: memref<1x32xf32, #tpu.memory_space<vmem>>, %arg4: memref<16x32xf32, #tpu.memory_space<vmem>>) attributes {dimension_semantics = [#tpu.dimension_semantics<parallel>], iteration_bounds = array<i64: 2>, scalar_prefetch = 0 : i64, scratch_operands = 0 : i64, tpu.core_type = #tpu.core_type<tc>, window_params = [{transform_indices = @transform_0, window_bounds = array<i64: 16, 16>}, {pipeline_mode = #tpu.pipeline_mode<synchronous>, transform_indices = @transform_1, window_bounds = array<i64: 16, 32>}, {pipeline_mode = #tpu.pipeline_mode<synchronous>, transform_indices = @transform_2, window_bounds = array<i64: 1, 32>}, {transform_indices = @transform_3, window_bounds = array<i64: 16, 32>}]} {
    %c0 = arith.constant 0 : index
    %c0_0 = arith.constant 0 : index
    %0 = vector.load %arg1[%c0, %c0_0] : memref<16x16xf32, #tpu.memory_space<vmem>>, vector<16x16xf32>
    %cst = arith.constant dense<0.000000e+00> : vector<16xf32>
    %1 = vector.multi_reduction <add>, %0, %cst [1] : vector<16x16xf32> to vector<16xf32>
    %2 = vector.shape_cast %1 : vector<16xf32> to vector<16x1xf32>
    %cst_1 = arith.constant 1.600000e+01 : f32
    %3 = vector.broadcast %cst_1 : f32 to vector<16x1xf32>
    %4 = arith.divf %2, %3 : vector<16x1xf32>
    %5 = vector.broadcast %4 : vector<16x1xf32> to vector<16x16xf32>
    %6 = arith.subf %0, %5 : vector<16x16xf32>
    %7 = arith.mulf %6, %6 : vector<16x16xf32>
    %cst_2 = arith.constant dense<0.000000e+00> : vector<16xf32>
    %8 = vector.multi_reduction <add>, %7, %cst_2 [1] : vector<16x16xf32> to vector<16xf32>
    %9 = vector.shape_cast %8 : vector<16xf32> to vector<16x1xf32>
    %cst_3 = arith.constant 1.600000e+01 : f32
    %10 = vector.broadcast %cst_3 : f32 to vector<16x1xf32>
    %11 = arith.divf %9, %10 : vector<16x1xf32>
    %cst_4 = arith.constant 9.99999974E-6 : f32
    %12 = vector.broadcast %cst_4 : f32 to vector<16x1xf32>
    %13 = arith.addf %11, %12 : vector<16x1xf32>
    %14 = math.rsqrt %13 : vector<16x1xf32>
    %15 = vector.broadcast %14 : vector<16x1xf32> to vector<16x16xf32>
    %16 = arith.mulf %6, %15 : vector<16x16xf32>
    %cst_5 = arith.constant 5.000000e-01 : f32
    %17 = vector.broadcast %cst_5 : f32 to vector<16x16xf32>
    %18 = arith.mulf %17, %16 : vector<16x16xf32>
    %cst_6 = arith.constant 0.707106769 : f32
    %19 = vector.broadcast %cst_6 : f32 to vector<16x16xf32>
    %20 = arith.mulf %16, %19 : vector<16x16xf32>
    %21 = math.erf %20 : vector<16x16xf32>
    %cst_7 = arith.constant 1.000000e+00 : f32
    %22 = vector.broadcast %cst_7 : f32 to vector<16x16xf32>
    %23 = arith.addf %22, %21 : vector<16x16xf32>
    %24 = arith.mulf %18, %23 : vector<16x16xf32>
    %25 = arith.truncf %24 : vector<16x16xf32> to vector<16x16xbf16>
    %c0_8 = arith.constant 0 : index
    %c0_9 = arith.constant 0 : index
    %26 = vector.load %arg2[%c0_8, %c0_9] : memref<16x32xbf16, #tpu.memory_space<vmem>>, vector<16x32xbf16>
    %cst_10 = arith.constant dense<0.000000e+00> : vector<16x32xf32>
    %27 = tpu.matmul %25, %26, %cst_10 {dimension_numbers = #tpu.dot_dimension_numbers<[1], [0], [0], [1], [0, 0, 1, 1], [], []>} : vector<16x16xbf16>, vector<16x32xbf16>, vector<16x32xf32> -> vector<16x32xf32>
    %c0_11 = arith.constant 0 : index
    %c0_12 = arith.constant 0 : index
    %28 = vector.load %arg3[%c0_11, %c0_12] : memref<1x32xf32, #tpu.memory_space<vmem>>, vector<1x32xf32>
    %29 = vector.broadcast %28 : vector<1x32xf32> to vector<16x32xf32>
    %30 = arith.addf %27, %29 : vector<16x32xf32>
    %c0_13 = arith.constant 0 : index
    %c0_14 = arith.constant 0 : index
    %31 = vector.load %arg4[%c0_13, %c0_14] : memref<16x32xf32, #tpu.memory_space<vmem>>, vector<16x32xf32>
    tpu.vector_store %arg4[%c0_13, %c0_14], %30 {strides = array<i32>} : memref<16x32xf32, #tpu.memory_space<vmem>>, vector<16x32xf32>,
    return
  }
  func.func @transform_0(%arg0: i32) -> (i32, i32) {
    %c0_i32 = arith.constant 0 : i32
    %c0_i32_0 = arith.constant 0 : i32
    return %arg0, %c0_i32 : i32, i32
  }
  func.func @transform_1(%arg0: i32) -> (i32, i32) {
    %c0_i32 = arith.constant 0 : i32
    %c0_i32_0 = arith.constant 0 : i32
    %c0_i32_1 = arith.constant 0 : i32
    return %c0_i32, %c0_i32_0 : i32, i32
  }
  func.func @transform_2(%arg0: i32) -> (i32, i32) {
    %c0_i32 = arith.constant 0 : i32
    %c0_i32_0 = arith.constant 0 : i32
    %c0_i32_1 = arith.constant 0 : i32
    return %c0_i32, %c0_i32_0 : i32, i32
  }
  func.func @transform_3(%arg0: i32) -> (i32, i32) {
    %c0_i32 = arith.constant 0 : i32
    %c0_i32_0 = arith.constant 0 : i32
    return %arg0, %c0_i32 : i32, i32
  }
}

</mosaic_0001>

<bundles_post_ra>
// kernel: tpu_custom_call.1
= control target key start
LH: loop header
LB: loop body
LE: loop exit
PB: predicated region body
PF: predicated region fallthrough
CT: control target
= control target key end

     0   :  { %8 = vsyncpa [#allocation3], 0  ;;  %s630_s0 = inlined_call_operand.vmem [shape: f32[32,16], index: 0, kind: input, shape index: {}]   ;;  %s631_s1 = inlined_call_operand.vmem [shape: bf16[16,32], index: 1, kind: input, shape index: {}]   ;;  %s632_s2 = inlined_call_operand.vmem [shape: f32[1,32], index: 2, kind: input, shape index: {}]   ;;  %s633_s3 = inlined_call_operand.hbm [shape: f32[32,32], index: 3, kind: output, shape index: {}]  }
   0x1   :  { %10 = vsyncpa [#allocation3 + $0x1], 0  ;;  %s517_s12 = smov 0   ;;  %s519_s13 = smov 0  }
   0x2   :  { %s521_s14 = smov 0   ;;  %s523_s15 = smov 0  }
   0x3 LB: > { %s538_s16 = sadd.s32 4294967295, %s490_s15   ;;  %s352_s17 = sadd.s32 4294967294, %s490_s15   ;;  %s490_s15 = sphi %s523_s15, %s639_s15   ;;  %s486_s14 = sphi %s521_s14, %s638_s14   ;;  %s482_s13 = sphi %s519_s13, %s637_s13   ;;  %s478_s12 = sphi %s517_s12, %s636_s12  }
   0x4   : > { %s542_s18 = sadd.s32 1, %s490_s15   ;;  %s91_s19 = sadd.s32 1, %s486_s14 }
   0x5   : > { %s88_s20 = ssub.s32 %s490_s15, %s542_s18  ;;  %p101_p0 = scmp.ne.s32.totalorder %s486_s14, %s482_s13 }
   0x6   : > { %p89_p1 = scmp.eq.s32.totalorder %s88_s20, 0  ;;  %p102_p2 = scmp.eq.s32.totalorder %s538_s16, 1 }
   0x7   : > { %p107_p3 = scmp.ne.s32.totalorder %s482_s13, %s478_s12  ;;  %p108_p4 = scmp.eq.s32.totalorder %s352_s17, 1 }
   0x8   : > { %s553_s21 = scalar_select %p89_p1, %s486_s14, %s91_s19  }
   0x9   : > { %p555_p5 = por %p102_p2, %p101_p0  ;;  %p559_p6 = por %p108_p4, %p107_p3 }
   0xa   : > { %p355_p7 = scmp.ge.s32.totalorder %s490_s15, 1  ;;  %p141_p8 = scmp.lt.s32.totalorder %s490_s15, 3 }
   0xc   : > { %p142_p9 = pnand %p355_p7, %p141_p8 }
   0xd   : > { %s357_s24 = sshll.u32 (!%p142_p9), %s538_s16, 1  ;;  %vm175_vm0 = vcmask (!%p142_p9), 130048   ;;  %v419_v14 = vld [vmem:[%s631_s1] sm:$0xff] (!%p142_p9)   ;;  %v492_v15 = vmov (!%p142_p9), 0.0   ;;  %vm493_vm1 = vmmov (!%p142_p9), 0   ;;  %s162_s4 = sand.u32 (!%p142_p9), 1, %s482_s13  }
   0xe   : > { %145 = sbr.rel (%p142_p9) target bundleno = 588 (0x24c), region = 32  ;;  %p166_p10 = scmp.lt.s32.totalorder (!%p142_p9), %s357_s24, 3  ;;  %370 = vmatprep.subr.bf16.mxu0 (!%p142_p9), %v492_v15  ;;  %372 = vmatprep.mubr.msk.bf16.mxu0 (!%p142_p9), %vm493_vm1, %v492_v15  ;;  %v359_v37 = vld [vmem:[%s632_s2] ss:$0 sm:$0xff] (!%p142_p9)  ;;  %vm273_vm2 = vcmask (!%p142_p9), 261120  }
   0xf   : > { %371 = vmatpush3.bf16.msra.mxu0 (!%p142_p9), %v419_v14  ;;  %s356_s5 = sshll.u32 (!%p142_p9), %s162_s4, 4  ;;  %s367_s10 = sshll.u32 (!%p142_p9), %s538_s16, 8 }
  0x10   : > { %s164_s8 = scalar_lea.vmem (!%p142_p9), [#allocation2], %s356_s5  ;;  %s587_s19 = scalar_lea.hbm (!%p142_p9), %s633_s3, %s367_s10 }
  0x11   : > { %s290_s9 = sshll.u32 (!%p142_p9), %s164_s8, 4  ;;  %s589_s16 = scalar_lea.sflag (!%p142_p9), [#allocation3], %s162_s4  ;;  %s582_s9 = int_to_ptr.vmem [resolvable:$true] %s290_s9 }
  0x12   : > { %s428_s20 = scalar_lea.vmem (!%p142_p9), %s582_s9, 256 }
  0x13   : > { %p429_p11 = scmp.ne.s32.totalorder (!%p142_p9), %s582_s9, %s428_s20 }
  0x15   : > { %s641_s24 = smov (!%p166_p10, %s357_s24), 3  ;;  %p430_p12 = pnand %p429_p11, %p555_p5 }
  0x16   : > { %s358_s25 = sshll.u32 %s641_s24, 3  ;;  %s494_s24 = smov [#allocation2]  }
  0x17   : > { %s169_s28 = scalar_lea.vmem %s630_s0, %s358_s25  ;;  %p431_p13 = pneg %p430_p12 }
  0x18   : > { %v173_v0 = vld [vmem:[%s169_s28] sm:$0xff]  ;;  %v174_v1 = vld [vmem:[%s169_s28 + $0x8] sm:$0xff]  ;;  %s432_s25 = sshll.u32 %s494_s24, 4  ;;  %s433_s25 = int_to_ptr.vmem [resolvable:$false] %s432_s25 }
  0x19   : > { %v176_v2 = vsel %vm175_vm0, %v173_v0, 0.0  ;;  %v179_v3 = vsel %vm175_vm0, %v174_v1, 0.0  ;;  %s434_s26 = scalar_lea.vmem %s433_s25, 512  ;;  %p435_p0 = scmp.lt.s32.totalorder %s582_s9, %s433_s25 }
  0x1a   : > { %177 = vadd.xlane.f32.xlu0 %v176_v2  ;;  %p436_p1 = scmp.lt.s32.totalorder %s434_s26, %s428_s20 }
  0x1c   : > { %p437_p2 = por %p436_p1, %p435_p0 }
  0x1e   : > { %180 = vadd.xlane.f32.xlu0 %v179_v3  ;;  %p438_p3 = pnand %p437_p2, %p431_p13 }
  0xa7   : > { %v178_v4 = vpop.xlane.xlu0 %177 }
  0xa8   : > { %v183_v5 = vmul.f32 0.0625, %v178_v4 }
  0xaa   : > { %v185_v6 = vsub.f32 %v173_v0, %v183_v5 }
  0xab   : > { %v181_v7 = vpop.xlane.xlu0 %180 }
  0xac   : > { %v184_v8 = vmul.f32 0.0625, %v181_v7  ;;  %v187_v9 = vmul.f32 %v185_v6, %v185_v6 }
  0xae   : > { %v186_v10 = vsub.f32 %v174_v1, %v184_v8  ;;  %v189_v11 = vsel %vm175_vm0, %v187_v9, 0.0 }
  0xaf   : > { %190 = vadd.xlane.f32.xlu1 %v189_v11 }
  0xb0   : > { %v188_v12 = vmul.f32 %v186_v10, %v186_v10 }
  0xb2   : > { %v192_v13 = vsel %vm175_vm0, %v188_v12, 0.0 }
  0xb3   : > { %193 = vadd.xlane.f32.xlu1 %v192_v13 }
 0x13c   : > { %v191_v16 = vpop.xlane.xlu1 %190 }
 0x13d   : > { %v195_v17 = vmul.f32 0.0625, %v191_v16 }
 0x13f   : > { %v197_v18 = vadd.f32 1e-05, %v195_v17 }
 0x140   : > { %v194_v19 = vpop.xlane.xlu1 %193 }
 0x141   : > { %420 = vrsqrt.f32 %v197_v18  ;;  %v196_v20 = vmul.f32 0.0625, %v194_v19 }
 0x143   : > { %v198_v21 = vadd.f32 1e-05, %v196_v20 }
 0x145   : > { %422 = vrsqrt.f32 %v198_v21 }
 0x14b   : > { %v421_v22 = vpop.eup %420 }
 0x14c   : > { %v201_v23 = vmul.f32 %v421_v22, %v185_v6 }
 0x14e   : > { %v205_v24 = vmul.f32 0.70710677, %v201_v23  ;;  %v203_v31 = vmul.f32 0.5, %v201_v23 }
 0x14f   : > { %v423_v25 = vpop.eup %422 }
 0x150   : > { %v202_v26 = vmul.f32 %v423_v25, %v186_v10  ;;  %424 = verf.f32 %v205_v24 }
 0x152   : > { %v206_v27 = vmul.f32 0.70710677, %v202_v26  ;;  %v204_v32 = vmul.f32 0.5, %v202_v26 }
 0x154   : > { %426 = verf.f32 %v206_v27 }
 0x15a   : > { %v425_v28 = vpop.eup %424 }
 0x15b   : > { %v209_v29 = vadd.f32 1.0, %v425_v28 }
 0x15d   : > { %v211_v34 = vmul.f32 %v209_v29, %v203_v31 }
 0x15e   : > { %v427_v30 = vpop.eup %426 }
 0x15f   : > { %v210_v33 = vadd.f32 1.0, %v427_v30 }
 0x161   : > { %v212_v35 = vmul.f32 %v210_v33, %v204_v32 }
 0x163   : > { %v213_v36 = vpack.c.bf16 %v212_v35, %v211_v34 }
 0x165   : > { %373 = vmatmul.mubr.msk.bf16.vlgmr.msra.gmra.mrb[0].mxu0 %vm175_vm0, %v213_v36 }
 0x238   : > { %v266_v38 = vpop.f32.mrb[0].mxu0 }
 0x239   : > { %v267_v39 = vadd.f32 %v359_v37, %v266_v38  ;;  %v374_v40 = vpop.f32.mrb[1].mxu0 }
 0x23a   : > { %v269_v41 = vpop.f32.mrb[2].mxu0 }
 0x23b   : > { %274 = vst.msk [vmem:[%s164_s8] sm:$0xff] %vm273_vm2, %v267_v39  ;;  %v270_v42 = vadd.f32 %v359_v37, %v269_v41  ;;  %v375_v43 = vpop.f32.mrb[3].mxu0 }
 0x23d   : > { %275 = vst.msk [vmem:[%s164_s8 + $0x8] sm:$0xff] %vm273_vm2, %v270_v42 }
 0x23e   : > { %441 = shalt.err (!%p438_p3)
}
 0x23f   : > { %s442_s27 = scalar_lea.hbm %s587_s19, 256  ;;  %s446_s30 = scalar_lea.hbm %s633_s3, 512 }
 0x240   : > { %p443_p4 = scmp.ne.s32.totalorder %s587_s19, %s442_s27  ;;  %p447_p9 = scmp.lt.u32.totalorder %s587_s19, %s633_s3 }
 0x241   : > { %p448_p10 = scmp.lt.u32.totalorder %s446_s30, %s442_s27  ;;  %p450_p12 = scmp.lt.u32.totalorder %s442_s27, %s587_s19 }
 0x242   : > { %p444_p7 = pnand %p443_p4, %p555_p5 }
 0x243   : > { %p449_p11 = por %p448_p10, %p447_p9 }
 0x244   : > { %p445_p8 = pneg %p444_p7 }
 0x245   : > { %p451_p13 = por %p450_p12, %p449_p11 }
 0x247   : > { %p452_p0 = pnand %p451_p13, %p445_p8 }
 0x249   : > { %455 = shalt.err (!%p452_p0)
}
 0x24a   : > { %s495_s6 = smov 128   ;;  %s496_s7 = smov 8  }
 0x24b   : > { %376 = dma.vmem_to_hbm [thread:$0]  (%p555_p5), %s582_s9, 256, %s587_s19, %s589_s16, %s495_s6, %s495_s6, %s496_s7  }
 0x24c PF: > { %p382_p1 = scmp.ge.s32.totalorder %s490_s15, 2  ;;  %s305_s8 = sand.u32 1, %s478_s12  }
 0x24d   : > { %s306_s10 = scalar_lea.sflag [#allocation3], %s305_s8 }
 0x24e   : > { %p379_p2 = pnand %p382_p1, %p559_p6 }
 0x250   : > { %473 = dma.done.wait (!%p379_p2), %s306_s10, 256  }
 0x251   : > { %475 = vsyncadd (!%p379_p2), %s306_s10, 4294967040  ;;  %p13_p3 = scmp.ge.s32.totalorder %s542_s18, 4   ;;  %s636_s12 = smov %s482_s13 }
 0x252   : > { %s637_s13 = smov %s486_s14  ;;  %s638_s14 = smov %s553_s21 }
 0x253   : > { %s639_s15 = smov %s542_s18  ;;  %15 = sbr.rel (!%p13_p3) target bundleno = 3 (0x3), region = 67 }
 0x25a   :  { %311 = vsyncpa [#allocation3], 1 }
 0x25b   :  { %313 = vsyncpa [#allocation3 + $0x1], 1 }

</bundles_post_ra>
